<compile_context>
chip_gen: v6e
topology: v6e:2x2x1
jax: 0.10.0
libtpu: 0.0.40
codegen_flags: <defaults>
</compile_context>

<pallas_src>
import jax
import jax.numpy as jnp
from jax.experimental import pallas as pl
from jax.experimental.pallas import tpu as pltpu

_NEG_LARGE = -1e30                       # finite "-inf" for padded vocab columns
_LANE = 128
_V5E_SCOPED_DEFAULT = 16 * 1024 * 1024   # smallest per-generation scoped-VMEM default


def _round_up(x, m):
    return (x + m - 1) // m * m


def _cdiv(a, b):
    return -(-a // b)


def _largest_divisor_tile(total, unit, max_tile):
    """Largest multiple-of-`unit` divisor of `total` that is <= max_tile (>= unit)."""
    n = total // unit
    best = 1
    for d in range(1, n + 1):
        if n % d == 0 and d * unit <= max_tile:
            best = d
    return best * unit


def _vmem_budget_bytes():
    """Per-TensorCore VMEM budget for our tiles, leaving headroom for Mosaic scratch."""
    try:
        cap = pltpu.get_tpu_info().vmem_capacity_bytes
    except Exception:
        cap = 64 * 1024 * 1024           # assume the tightest case (v7x per-TC)
    return int(cap * 3 // 4)             # ~48 MiB on v7x, ~96 MiB on v5e/v6e


def _vmem_needed_bytes(tB, tk, Vp, n_k, x_bytes, out_bytes):
    w_bufs = 1 if n_k == 1 else 2        # grid-invariant weight -> single-buffered
    return (2 * tB * tk * x_bytes        # x tile, double-buffered
            + w_bufs * tk * Vp * x_bytes # weight tile(s)
            + 1 * Vp * 4                 # bias, single-buffered (grid-invariant)
            + 2 * tB * Vp * out_bytes    # output tile, double-buffered
            + tB * Vp * 4)               # f32 accumulator scratch


def _adv_content_kernel(x_ref, w_ref, b_ref, o_ref, acc_ref):
    """One (batch-tile, K-tile) step of fused Linear + softmax.

    x_ref: [tB, tk]      w_ref: [tk, Vp]      b_ref: [1, Vp] (f32; pads hold -1e30)
    o_ref: [tB, Vp]      acc_ref: [tB, Vp] f32 scratch, persistent across the K axis
    """
    k = pl.program_id(1)

    @pl.when(k == 0)
    def _():
        acc_ref[...] = jnp.zeros_like(acc_ref)

    acc_ref[...] += jnp.dot(x_ref[...], w_ref[...],
                            preferred_element_type=jnp.float32)

    @pl.when(k == pl.num_programs(1) - 1)
    def _():
        logits = acc_ref[...] + b_ref[...]
        m = jnp.max(logits, axis=-1, keepdims=True)      # XLU cross-lane reduce
        e = jnp.exp(logits - m)                          # EUP exp
        s = jnp.sum(e, axis=-1, keepdims=True)
        inv = pl.reciprocal(s, approx=True)              # EUP vrcp (idle slot)
        inv = inv * (2.0 - s * inv)                      # one Newton step -> ~f32 exact
        o_ref[...] = (e * inv).astype(o_ref.dtype)


def prepare_params(w, b, *, param_dtype=jnp.float32):
    """Pad/cast the Linear parameters ONCE at setup time (hoisted out of forward).

    w: [D, V] (torch weight pre-transposed), b: [V].
    Returns (wp [Dp, Vp], bp [1, Vp] f32, (D, V)).  Padded vocab columns of the
    bias hold a large negative value so their softmax probability is exactly 0.
    """
    D, V = w.shape
    Dp, Vp = _round_up(D, _LANE), _round_up(V, _LANE)
    wp = w.astype(param_dtype)
    if (Dp, Vp) != (D, V):
        wp = jnp.pad(wp, ((0, Dp - D), (0, Vp - V)))
    bp = b.astype(jnp.float32)
    if Vp != V:
        bp = jnp.pad(bp, (0, Vp - V), constant_values=_NEG_LARGE)
    return wp, bp.reshape(1, Vp), (D, V)


def adv_content_classifier(x, wp, bp, dims, *, batch_tile=256, k_tile=None,
                           out_dtype=jnp.float32, batch_parallel=None):
    """softmax(x @ W + b, axis=-1).squeeze(0) -> [B, V].

    x: [1, B, D] activations; wp/bp/dims come from prepare_params().
    out_dtype=f32 (default) matches PyTorch numerics; bf16 output is opt-in
    (v6e/v7x byte-reduction; keep f32 on v5e if exact parity is needed downstream).
    """
    assert x.ndim == 3 and x.shape[0] == 1
    _, B, D = x.shape
    D_real, V = dims
    assert D == D_real, "activation feature dim must match the prepared weight"
    Dp, Vp = wp.shape

    in_dtype = wp.dtype                           # MXU operand dtype follows the weight
    x_bytes = jnp.dtype(in_dtype).itemsize
    out_bytes = jnp.dtype(out_dtype).itemsize
    row_align = 16 if x_bytes < 4 else 8          # bf16 packs 2 rows per sublane

    # --- batch tiling: balanced tiles -> bounded padding ----------------------
    tB_cap = max(row_align, _round_up(min(batch_tile, B), row_align))
    n_b = _cdiv(B, tB_cap)
    tB = _round_up(_cdiv(B, n_b), row_align)

    # --- K tiling against the per-core VMEM budget ----------------------------
    budget = _vmem_budget_bytes()
    tk = Dp if k_tile is None else _largest_divisor_tile(Dp, _LANE, max(k_tile, _LANE))
    while (_vmem_needed_bytes(tB, tk, Vp, Dp // tk, x_bytes, out_bytes) > budget
           and tk > _LANE):
        tk = _largest_divisor_tile(Dp, _LANE, tk - _LANE)
    while (_vmem_needed_bytes(tB, tk, Vp, Dp // tk, x_bytes, out_bytes) > budget
           and tB > row_align):
        tB = max(row_align, _round_up(tB // 2, row_align))
    # TODO(synk): for vocabularies too large even for (8, 128) tiles, tile V with an
    #             online softmax instead of holding a full [tB, Vp] accumulator.

    n_b = _cdiv(B, tB)
    Bp = n_b * tB
    n_k = Dp // tk
    vmem_needed = _vmem_needed_bytes(tB, tk, Vp, n_k, x_bytes, out_bytes)

    # --- pad & cast activations (per-call; params were prepared once) ---------
    x2d = x.reshape(B, D).astype(in_dtype)
    if (Bp, Dp) != (B, D):
        x2d = jnp.pad(x2d, ((0, Bp - B), (0, Dp - D)))

    # --- megacore: a batch split duplicates the weight read on each TC --------
    if batch_parallel is None:
        weight_read = Dp * Vp * x_bytes
        row_streams = Bp * (Dp * x_bytes + Vp * out_bytes)
        batch_parallel = n_b >= 2 and row_streams >= 4 * weight_read
    batch_sem = "parallel" if batch_parallel else "arbitrary"

    cp_kwargs = dict(dimension_semantics=(batch_sem, "arbitrary"))
    if vmem_needed > _V5E_SCOPED_DEFAULT * 3 // 4:   # v5e's scoped default is 16 MiB
        cp_kwargs["vmem_limit_bytes"] = int(
            min(max(vmem_needed * 5 // 4, _V5E_SCOPED_DEFAULT), budget))

    cost = pl.CostEstimate(
        flops=2 * Bp * Dp * Vp,
        transcendentals=Bp * Vp,
        bytes_accessed=(Bp * Dp + Dp * Vp) * x_bytes + Vp * 4 + Bp * Vp * out_bytes,
    )

    single = pl.Buffered(buffer_count=1)             # grid-invariant -> one buffer
    if n_k == 1:
        w_spec = pl.BlockSpec((tk, Vp), lambda i, k: (k, 0), pipeline_mode=single)
    else:
        w_spec = pl.BlockSpec((tk, Vp), lambda i, k: (k, 0))   # stream & double-buffer

    out = pl.pallas_call(
        _adv_content_kernel,
        out_shape=jax.ShapeDtypeStruct((Bp, Vp), out_dtype),
        grid_spec=pltpu.PrefetchScalarGridSpec(
            num_scalar_prefetch=0,
            grid=(n_b, n_k),
            in_specs=[
                pl.BlockSpec((tB, tk), lambda i, k: (i, k)),       # activations stream
                w_spec,                                            # weight K-tiles
                pl.BlockSpec((1, Vp), lambda i, k: (0, 0),
                             pipeline_mode=single),                # bias (+pad mask)
            ],
            out_specs=pl.BlockSpec((tB, Vp), lambda i, k: (i, 0)),
            scratch_shapes=[pltpu.VMEM((tB, Vp), jnp.float32)],
        ),
        compiler_params=pltpu.CompilerParams(**cp_kwargs),
        cost_estimate=cost,
    )(x2d, wp, bp)

    if (Bp, Vp) == (B, V):
        return out
    return out[:B, :V]    # drop padding (glue; avoid by keeping B/V aligned upstream)


def _ref_forward(x, w, b):
    """Pure-JAX reference matching the PyTorch forward."""
    logits = jnp.einsum("sbd,dv->sbv", x.astype(jnp.float32),
                        w.astype(jnp.float32)) + b.astype(jnp.float32)
    return jax.nn.softmax(logits, axis=2)[0]


if __name__ == "__main__":
    key = jax.random.PRNGKey(0)
    kx, kw, kb, kx2, kw2 = jax.random.split(key, 5)

    # Shapes consistent with the module: x [1, Batch, Content_dim].
    input_dim, vocab_size, batch = 32, 64, 8

    x = jax.random.normal(kx, (1, batch, input_dim), dtype=jnp.float32)
    # torch Linear weight is [vocab, input_dim]; keep it pre-transposed as [D, V].
    w = (jax.random.normal(kw, (vocab_size, input_dim), dtype=jnp.float32)
         * (1.0 / jnp.sqrt(input_dim))).T
    b = jax.random.normal(kb, (vocab_size,), dtype=jnp.float32) * 0.1

    ref = _ref_forward(x, w, b)

    # 1) f32 path (PyTorch-parity numerics); parameters prepared once, reused.
    wp, bp, dims = prepare_params(w, b)
    out = jax.block_until_ready(adv_content_classifier(x, wp, bp, dims))
    assert out.shape == (batch, vocab_size)
    assert jnp.allclose(out, ref, atol=1e-5, rtol=1e-5)

    # 2) bf16 params + bf16 output (HBM-byte optimization; opt-in, loose tolerance).
    wp16, bp16, dims16 = prepare_params(w, b, param_dtype=jnp.bfloat16)
    out16 = jax.block_until_ready(
        adv_content_classifier(x, wp16, bp16, dims16, out_dtype=jnp.bfloat16))
    assert out16.shape == (batch, vocab_size) and out16.dtype == jnp.bfloat16
    assert jnp.allclose(out16.astype(jnp.float32), ref, atol=3e-2, rtol=3e-2)

    # 3) multi batch-tile + multi K-tile grid (exercises accumulator + epilogue).
    batch2, input_dim2 = 40, 256
    x2 = jax.random.normal(kx2, (1, batch2, input_dim2), dtype=jnp.float32)
    w2 = (jax.random.normal(kw2, (vocab_size, input_dim2), dtype=jnp.float32)
          * (1.0 / jnp.sqrt(input_dim2))).T
    ref2 = _ref_forward(x2, w2, b)
    wp2, bp2, dims2 = prepare_params(w2, b)
    out2 = jax.block_until_ready(
        adv_content_classifier(x2, wp2, bp2, dims2, batch_tile=16, k_tile=128))
    assert out2.shape == (batch2, vocab_size)
    assert jnp.allclose(out2, ref2, atol=1e-5, rtol=1e-5)

    print("KERNEL_OK")
</pallas_src>

<mosaic_0001>
module attributes {stable_mosaic.version = 11 : i64} {
  func.func @_adv_content_kernel(%arg0: i32, %arg1: i32, %arg2: memref<8x128xf32, #tpu.memory_space<vmem>>, %arg3: memref<128x128xf32, #tpu.memory_space<vmem>>, %arg4: memref<1x128xf32, #tpu.memory_space<vmem>>, %arg5: memref<8x128xf32, #tpu.memory_space<vmem>>, %arg6: memref<8x128xf32, #tpu.memory_space<vmem>>) attributes {dimension_semantics = [#tpu.dimension_semantics<arbitrary>, #tpu.dimension_semantics<arbitrary>], iteration_bounds = array<i64: 1, 1>, scalar_prefetch = 0 : i64, scratch_operands = 1 : i64, tpu.core_type = #tpu.core_type<tc>, window_params = [{transform_indices = @transform_0, window_bounds = array<i64: 8, 128>}, {pipeline_mode = #tpu.pipeline_mode<synchronous>, transform_indices = @transform_1, window_bounds = array<i64: 128, 128>}, {pipeline_mode = #tpu.pipeline_mode<synchronous>, transform_indices = @transform_2, window_bounds = array<i64: 1, 128>}, {transform_indices = @transform_3, window_bounds = array<i64: 8, 128>}]} {
    %c0_i32 = arith.constant 0 : i32
    %0 = arith.cmpi eq, %arg1, %c0_i32 : i32
    %1 = arith.extui %0 : i1 to i32
    %c0_i32_0 = arith.constant 0 : i32
    %2 = arith.cmpi ne, %1, %c0_i32_0 : i32
    scf.if %2 {
      %cst_10 = arith.constant 0.000000e+00 : f32
      %12 = vector.broadcast %cst_10 : f32 to vector<8x128xf32>
      %c0_11 = arith.constant 0 : index
      %c0_12 = arith.constant 0 : index
      %13 = vector.load %arg6[%c0_11, %c0_12] : memref<8x128xf32, #tpu.memory_space<vmem>>, vector<8x128xf32>
      tpu.vector_store %arg6[%c0_11, %c0_12], %12 {strides = array<i32>} : memref<8x128xf32, #tpu.memory_space<vmem>>, vector<8x128xf32>,
    } else {
    }
    %c0 = arith.constant 0 : index
    %c0_1 = arith.constant 0 : index
    %3 = vector.load %arg6[%c0, %c0_1] : memref<8x128xf32, #tpu.memory_space<vmem>>, vector<8x128xf32>
    %c0_2 = arith.constant 0 : index
    %c0_3 = arith.constant 0 : index
    %4 = vector.load %arg2[%c0_2, %c0_3] : memref<8x128xf32, #tpu.memory_space<vmem>>, vector<8x128xf32>
    %c0_4 = arith.constant 0 : index
    %c0_5 = arith.constant 0 : index
    %5 = vector.load %arg3[%c0_4, %c0_5] : memref<128x128xf32, #tpu.memory_space<vmem>>, vector<128x128xf32>
    %cst = arith.constant dense<0.000000e+00> : vector<8x128xf32>
    %6 = tpu.matmul %4, %5, %cst {dimension_numbers = #tpu.dot_dimension_numbers<[1], [0], [0], [1], [0, 0, 1, 1], [], []>} : vector<8x128xf32>, vector<128x128xf32>, vector<8x128xf32> -> vector<8x128xf32>
    %7 = arith.addf %3, %6 : vector<8x128xf32>
    %c0_6 = arith.constant 0 : index
    %c0_7 = arith.constant 0 : index
    %8 = vector.load %arg6[%c0_6, %c0_7] : memref<8x128xf32, #tpu.memory_space<vmem>>, vector<8x128xf32>
    tpu.vector_store %arg6[%c0_6, %c0_7], %7 {strides = array<i32>} : memref<8x128xf32, #tpu.memory_space<vmem>>, vector<8x128xf32>,
    %c0_i32_8 = arith.constant 0 : i32
    %9 = arith.cmpi eq, %arg1, %c0_i32_8 : i32
    %10 = arith.extui %9 : i1 to i32
    %c0_i32_9 = arith.constant 0 : i32
    %11 = arith.cmpi ne, %10, %c0_i32_9 : i32
    scf.if %11 {
      %c0_10 = arith.constant 0 : index
      %c0_11 = arith.constant 0 : index
      %12 = vector.load %arg6[%c0_10, %c0_11] : memref<8x128xf32, #tpu.memory_space<vmem>>, vector<8x128xf32>
      %c0_12 = arith.constant 0 : index
      %c0_13 = arith.constant 0 : index
      %13 = vector.load %arg4[%c0_12, %c0_13] : memref<1x128xf32, #tpu.memory_space<vmem>>, vector<1x128xf32>
      %14 = vector.broadcast %13 : vector<1x128xf32> to vector<8x128xf32>
      %15 = arith.addf %12, %14 : vector<8x128xf32>
      %cst_14 = arith.constant dense<0xFF800000> : vector<8xf32>
      %16 = vector.multi_reduction <maximumf>, %15, %cst_14 [1] : vector<8x128xf32> to vector<8xf32>
      %17 = vector.shape_cast %16 : vector<8xf32> to vector<8x1xf32>
      %18 = vector.broadcast %17 : vector<8x1xf32> to vector<8x128xf32>
      %19 = arith.subf %15, %18 : vector<8x128xf32>
      %20 = math.exp %19 : vector<8x128xf32>
      %cst_15 = arith.constant dense<0.000000e+00> : vector<8xf32>
      %21 = vector.multi_reduction <add>, %20, %cst_15 [1] : vector<8x128xf32> to vector<8xf32>
      %22 = vector.shape_cast %21 : vector<8xf32> to vector<8x1xf32>
      %23 = tpu.reciprocal %22 {approx = true} : vector<8x1xf32> -> vector<8x1xf32>
      %24 = arith.mulf %22, %23 : vector<8x1xf32>
      %cst_16 = arith.constant 2.000000e+00 : f32
      %25 = vector.broadcast %cst_16 : f32 to vector<8x1xf32>
      %26 = arith.subf %25, %24 : vector<8x1xf32>
      %27 = arith.mulf %23, %26 : vector<8x1xf32>
      %28 = vector.broadcast %27 : vector<8x1xf32> to vector<8x128xf32>
      %29 = arith.mulf %20, %28 : vector<8x128xf32>
      %c0_17 = arith.constant 0 : index
      %c0_18 = arith.constant 0 : index
      %30 = vector.load %arg5[%c0_17, %c0_18] : memref<8x128xf32, #tpu.memory_space<vmem>>, vector<8x128xf32>
      tpu.vector_store %arg5[%c0_17, %c0_18], %29 {strides = array<i32>} : memref<8x128xf32, #tpu.memory_space<vmem>>, vector<8x128xf32>,
    } else {
    }
    return
  }
  func.func @transform_0(%arg0: i32, %arg1: i32) -> (i32, i32) {
    %c0_i32 = arith.constant 0 : i32
    return %arg0, %arg1 : i32, i32
  }
  func.func @transform_1(%arg0: i32, %arg1: i32) -> (i32, i32) {
    %c0_i32 = arith.constant 0 : i32
    %c0_i32_0 = arith.constant 0 : i32
    return %arg1, %c0_i32 : i32, i32
  }
  func.func @transform_2(%arg0: i32, %arg1: i32) -> (i32, i32) {
    %c0_i32 = arith.constant 0 : i32
    %c0_i32_0 = arith.constant 0 : i32
    %c0_i32_1 = arith.constant 0 : i32
    return %c0_i32, %c0_i32_0 : i32, i32
  }
  func.func @transform_3(%arg0: i32, %arg1: i32) -> (i32, i32) {
    %c0_i32 = arith.constant 0 : i32
    %c0_i32_0 = arith.constant 0 : i32
    return %arg0, %c0_i32 : i32, i32
  }
}

</mosaic_0001>

<bundles_post_ra>
// kernel: tpu_custom_call.1
= control target key start
LH: loop header
LB: loop body
LE: loop exit
PB: predicated region body
PF: predicated region fallthrough
CT: control target
= control target key end

     0   :  { %8 = vsyncpa [#allocation4], 0  ;;  %s346_s0 = inlined_call_operand.hbm [shape: f32[8,128], index: 0, kind: input, shape index: {}]   ;;  %s347_s1 = inlined_call_operand.hbm [shape: f32[128,128], index: 1, kind: input, shape index: {}]   ;;  %s348_s2 = inlined_call_operand.vmem [shape: f32[1,128], index: 2, kind: input, shape index: {}]   ;;  %s349_s3 = inlined_call_operand.hbm [shape: f32[8,128], index: 3, kind: output, shape index: {}]  }
   0x1   :  { %9 = vsyncpa [#allocation7], 0 }
   0x2   :  { %10 = vsyncpa [#allocation5], 0  ;;  %s307_s12 = smov [#allocation3]   ;;  %s308_s14 = smov [#allocation6]  }
   0x3   :  { %s17_s13 = sshll.u32 %s307_s12, 4  ;;  %s26_s15 = sshll.u32 %s308_s14, 4  ;;  %s18_s13 = int_to_ptr.vmem [resolvable:$true] %s17_s13  ;;  %s27_s15 = int_to_ptr.vmem [resolvable:$true] %s26_s15 }
   0x4   :  { %s249_s16 = scalar_lea.vmem %s18_s13, 128  ;;  %p254_p1 = scmp.lt.s32.totalorder %s18_s13, %s18_s13 }
   0x5   :  { %p250_p0 = scmp.ne.s32.totalorder %s18_s13, %s249_s16  ;;  %p255_p2 = scmp.lt.s32.totalorder %s249_s16, %s249_s16 }
   0x7   :  { %p256_p3 = por %p255_p2, %p254_p1 }
   0x9   :  { %p257_p4 = pnand %p256_p3, %p250_p0 }
   0xb   :  { %260 = shalt.err (!%p257_p4)
}
   0xc   :  { %20 = dma.hbm_to_vmem [thread:$0]  %s346_s0, 128, %s18_s13, [#allocation4]  }
   0xd   :  { %s269_s19 = scalar_lea.vmem %s27_s15, 2048  ;;  %p274_p6 = scmp.lt.s32.totalorder %s27_s15, %s27_s15 }
   0xe   :  { %p270_p5 = scmp.ne.s32.totalorder %s27_s15, %s269_s19  ;;  %p275_p7 = scmp.lt.s32.totalorder %s269_s19, %s269_s19 }
  0x10   :  { %p276_p8 = por %p275_p7, %p274_p6 }
  0x12   :  { %p277_p9 = pnand %p276_p8, %p270_p5 }
  0x14   :  { %280 = shalt.err (!%p277_p9)
}
  0x15   :  { %s309_s20 = smov 128   ;;  %s310_s21 = smov 8  }
  0x16   :  { %32 = dma.hbm_to_vmem [thread:$0]  %s347_s1, 2048, %s27_s15, [#allocation7], %s309_s20, %s309_s20, %s310_s21  }
  0x17   :  { %301 = dma.done.wait [#allocation4], 128  }
  0x18   :  { %302 = vsyncadd [#allocation4], 4294967168 }
  0x19   :  { %303 = dma.done.wait [#allocation7], 2048  }
  0x1a   :  { %304 = vsyncadd [#allocation7], 4294965248  ;;  %v311_v0 = vmov 0.0   ;;  %vm312_vm0 = vmmov 0   ;;  %v63_v1 = vld [vmem:[#allocation6 + $0x78] sm:$0xff]  ;;  %v62_v2 = vld [vmem:[#allocation6 + $0x70] sm:$0xff] }
  0x1b   :  { %195 = vmatprep.subr.mxu0 %v311_v0  ;;  %227 = vmatprep.mubr.msk.f32.mxu0 %vm312_vm0, %v311_v0  ;;  %v61_v3 = vld [vmem:[#allocation6 + $0x68] sm:$0xff]  ;;  %v60_v4 = vld [vmem:[#allocation6 + $0x60] sm:$0xff]  ;;  %v59_v5 = vld [vmem:[#allocation6 + $0x58] sm:$0xff]  ;;  %s313_s24 = smov [#allocation8]  }
  0x1c   :  { %196 = vmatpush3.msra.mxu0 %v63_v1  ;;  %v58_v6 = vld [vmem:[#allocation6 + $0x50] sm:$0xff]  ;;  %v57_v7 = vld [vmem:[#allocation6 + $0x48] sm:$0xff]  ;;  %v56_v8 = vld [vmem:[#allocation6 + $0x40] sm:$0xff]  ;;  %s167_s25 = sshll.u32 %s313_s24, 4  ;;  %s168_s25 = int_to_ptr.vmem [resolvable:$true] %s167_s25 }
  0x1d   :  { %197 = vmatprep.subr.mxu0 %v311_v0  ;;  %v55_v9 = vld [vmem:[#allocation6 + $0x38] sm:$0xff]  ;;  %v54_v10 = vld [vmem:[#allocation6 + $0x30] sm:$0xff]  ;;  %v53_v11 = vld [vmem:[#allocation6 + $0x28] sm:$0xff]  ;;  %p286_p11 = scmp.lt.s32.totalorder %s168_s25, %s168_s25 }
  0x1e   :  { %198 = vmatpush3.msra.mxu0 %v62_v2  ;;  %v52_v12 = vld [vmem:[#allocation6 + $0x20] sm:$0xff]  ;;  %v51_v13 = vld [vmem:[#allocation6 + $0x18] sm:$0xff]  ;;  %v50_v14 = vld [vmem:[#allocation6 + $0x10] sm:$0xff] }
  0x1f   :  { %199 = vmatprep.subr.mxu0 %v311_v0  ;;  %v49_v15 = vld [vmem:[#allocation6 + $0x8] sm:$0xff]  ;;  %v48_v16 = vld [vmem:[#allocation6] sm:$0xff]  ;;  %v47_v17 = vld [vmem:[#allocation3] sm:$0xff] }
  0x20   :  { %200 = vmatpush3.msra.mxu0 %v61_v3  ;;  %v177_v18 = vld [vmem:[%s348_s2] ss:$0 sm:$0xff]  ;;  %s281_s2 = scalar_lea.vmem %s168_s25, 128 }
  0x21   :  { %201 = vmatprep.subr.mxu0 %v311_v0  ;;  %p282_p10 = scmp.ne.s32.totalorder %s168_s25, %s281_s2  ;;  %p287_p12 = scmp.lt.s32.totalorder %s281_s2, %s281_s2 }
  0x22   :  { %202 = vmatpush3.msra.mxu0 %v60_v4 }
  0x23   :  { %203 = vmatprep.subr.mxu0 %v311_v0  ;;  %p288_p13 = por %p287_p12, %p286_p11 }
  0x24   :  { %204 = vmatpush3.msra.mxu0 %v59_v5 }
  0x25   :  { %205 = vmatprep.subr.mxu0 %v311_v0  ;;  %p289_p0 = pnand %p288_p13, %p282_p10 }
  0x26   :  { %206 = vmatpush3.msra.mxu0 %v58_v6 }
  0x27   :  { %207 = vmatprep.subr.mxu0 %v311_v0 }
  0x28   :  { %208 = vmatpush3.msra.mxu0 %v57_v7 }
  0x29   :  { %209 = vmatprep.subr.mxu0 %v311_v0 }
  0x2a   :  { %210 = vmatpush3.msra.mxu0 %v56_v8 }
  0x2b   :  { %211 = vmatprep.subr.mxu0 %v311_v0 }
  0x2c   :  { %212 = vmatpush3.msra.mxu0 %v55_v9 }
  0x2d   :  { %213 = vmatprep.subr.mxu0 %v311_v0 }
  0x2e   :  { %214 = vmatpush3.msra.mxu0 %v54_v10 }
  0x2f   :  { %215 = vmatprep.subr.mxu0 %v311_v0 }
  0x30   :  { %216 = vmatpush3.msra.mxu0 %v53_v11 }
  0x31   :  { %217 = vmatprep.subr.mxu0 %v311_v0 }
  0x32   :  { %218 = vmatpush3.msra.mxu0 %v52_v12 }
  0x33   :  { %219 = vmatprep.subr.mxu0 %v311_v0 }
  0x34   :  { %220 = vmatpush3.msra.mxu0 %v51_v13 }
  0x35   :  { %221 = vmatprep.subr.mxu0 %v311_v0 }
  0x36   :  { %222 = vmatpush3.msra.mxu0 %v50_v14 }
  0x37   :  { %223 = vmatprep.subr.mxu0 %v311_v0 }
  0x38   :  { %224 = vmatpush3.msra.mxu0 %v49_v15 }
  0x39   :  { %225 = vmatprep.subr.mxu0 %v311_v0 }
  0x3a   :  { %226 = vmatpush3.msra.mxu0 %v48_v16 }
  0x3b   :  { %228 = vmatmul.mubr.f32.vlgmr.msra.gmra.mxu0 %v47_v17 }
  0xfb   :  { %v130_v19 = vpop.f32.mrf.mxu0 }
  0xfc   :  { %v147_v20 = vadd.f32 %v177_v18, %v130_v19 }
  0xfd   :  { %v229_v21 = vpop.f32.mrf.mxu0 }
  0xfe   :  { %148 = vmax.xlane.f32.xlu0 %v147_v20 }
 0x187   :  { %v149_v22 = vpop.xlane.xlu0 %148 }
 0x188   :  { %v150_v23 = vsub.f32 %v147_v20, %v149_v22 }
 0x18a   :  { %v151_v24 = vmul.f32 1.442695, %v150_v23 }
 0x18c   :  { %237 = vpow2.f32 %v151_v24 }
 0x199   :  { %v238_v25 = vpop.eup %237 }
 0x19a   :  { %153 = vadd.xlane.f32.xlu0 %v238_v25 }
 0x223   :  { %v154_v26 = vpop.xlane.xlu0 %153 }
 0x224   :  { %239 = vrcp.f32 %v154_v26 }
 0x231   :  { %v240_v27 = vpop.eup %239 }
 0x232   :  { %v156_v28 = vmul.f32 %v240_v27, %v154_v26 }
 0x234   :  { %v157_v29 = vsub.f32 2.0, %v156_v28 }
 0x236   :  { %v158_v30 = vmul.f32 %v240_v27, %v157_v29 }
 0x238   :  { %v159_v31 = vmul.f32 %v238_v25, %v158_v30 }
 0x23a   :  { %160 = vst [vmem:[#allocation8] sm:$0xff] %v159_v31 }
 0x23b   :  { %292 = shalt.err (!%p289_p0)
}
 0x23c   :  { %170 = dma.vmem_to_hbm [thread:$0]  %s168_s25, 128, %s349_s3, [#allocation5]  }
 0x23d   :  { %305 = dma.done.wait [#allocation5], 128  }
 0x23e   :  { %306 = vsyncadd [#allocation5], 4294967168 }
 0x23f   :  { %174 = vsyncpa [#allocation4], 1 }
 0x240   :  { %175 = vsyncpa [#allocation7], 1 }
 0x241   :  { %176 = vsyncpa [#allocation5], 1 }

</bundles_post_ra>
